<compile_context>
chip_gen: v6e
topology: v6e:2x2x1
jax: 0.10.0
libtpu: 0.0.40
codegen_flags: <defaults>
</compile_context>

<pallas_src>
import math

import jax
import jax.numpy as jnp
from jax.experimental import pallas as pl
from jax.experimental.pallas import tpu as pltpu

NOISY_LAYER_STD = 0.1  # Config.NOISY_LAYER_STD in deeprl


# --------------------------------------------------------------------------
# Kernels
# --------------------------------------------------------------------------
def _noisy_linear_kernel(x_ref, wmu_ref, wsig_ref, eps_in_ref, eps_out_ref,
                         bmu_ref, bsig_ref, beps_ref, o_ref, acc_ref):
    """Training-mode tile: acc += x_tile @ (wmu + wsig * (eps_in ⊗ eps_out))."""
    k = pl.program_id(2)

    @pl.when(k == 0)
    def _init():
        acc_ref[...] = jnp.zeros_like(acc_ref)

    # Rebuild the factorized epsilon tile in-register: [tk,1] * [1,tn] -> [tk,tn].
    eps_tile = eps_in_ref[...] * eps_out_ref[...]
    w = wmu_ref[...] + wsig_ref[...] * eps_tile          # [tk, tn], VPU FMA
    # Weights are pre-transposed to [In, Out]: no in-kernel .T / XLU shuffle.
    acc_ref[...] += jnp.dot(x_ref[...], w, preferred_element_type=jnp.float32)

    @pl.when(k == pl.num_programs(2) - 1)
    def _finalize():
        b = bmu_ref[...] + bsig_ref[...] * beps_ref[...]  # [1, tn]
        o_ref[...] = (acc_ref[...] + b).astype(o_ref.dtype)


def _plain_linear_kernel(x_ref, w_ref, b_ref, o_ref, acc_ref):
    """Eval-mode tile: acc += x_tile @ w_mu_tile; no sigma/epsilon traffic."""
    k = pl.program_id(2)

    @pl.when(k == 0)
    def _init():
        acc_ref[...] = jnp.zeros_like(acc_ref)

    acc_ref[...] += jnp.dot(x_ref[...], w_ref[...],
                            preferred_element_type=jnp.float32)

    @pl.when(k == pl.num_programs(2) - 1)
    def _finalize():
        o_ref[...] = (acc_ref[...] + b_ref[...]).astype(o_ref.dtype)


# --------------------------------------------------------------------------
# Tiling / padding helpers
# --------------------------------------------------------------------------
def _round_up(n, m):
    return ((n + m - 1) // m) * m


def _tile_and_pad(dim, unit, cap):
    """Pick a tile size (multiple of `unit`, at most `cap`) and the padded dim."""
    t = min(cap, _round_up(dim, unit))
    padded = _round_up(dim, t)
    return t, padded


def _pad2(a, rows, cols):
    return jnp.pad(a, ((0, rows - a.shape[0]), (0, cols - a.shape[1])))


def _pad_row(v, n):
    return jnp.pad(v, (0, n - v.shape[0])).reshape(1, n)


def _pad_col(v, n):
    return jnp.pad(v, (0, n - v.shape[0])).reshape(n, 1)


# Conservative caps keep VMEM use well under v7x's 64 MiB (double-buffered
# inputs + f32 accumulator stay < ~8 MiB) while still giving lane-dense tiles.
_TM_CAP, _TN_CAP, _TK_CAP = 256, 256, 512
_VMEM_LIMIT = 32 * 1024 * 1024  # safe on v5e/v6e/v7x


def _grid_params(B, In, Out):
    tm, Bp = _tile_and_pad(B, 8, _TM_CAP)
    tk, Inp = _tile_and_pad(In, 128, _TK_CAP)
    tn, Outp = _tile_and_pad(Out, 128, _TN_CAP)
    grid = (Bp // tm, Outp // tn, Inp // tk)
    return tm, tn, tk, Bp, Inp, Outp, grid


# --------------------------------------------------------------------------
# Wrappers
# --------------------------------------------------------------------------
def noisy_linear_train(x, weight_mu, weight_sigma, eps_in, eps_out_w,
                       bias_mu, bias_sigma, bias_epsilon):
    """Training-mode forward. x: [B, In] -> [B, Out].

    eps_in / eps_out_w are the 1-D factorized-noise vectors
    (transform_noise(noise_in), transform_noise(noise_out_weight)), i.e.
    weight_epsilon == outer(eps_out_w, eps_in) as built by reset_noise().
    """
    B, In = x.shape
    Out = weight_mu.shape[0]
    tm, tn, tk, Bp, Inp, Outp, grid = _grid_params(B, In, Out)

    xp = _pad2(x, Bp, Inp)
    # Pre-transpose once to [In, Out] so the kernel needs no transpose.
    wmu_t = _pad2(weight_mu.T, Inp, Outp)
    wsig_t = _pad2(weight_sigma.T, Inp, Outp)
    eps_in_p = _pad_col(eps_in, Inp)       # [Inp, 1]
    eps_out_p = _pad_row(eps_out_w, Outp)  # [1, Outp]
    bmu = _pad_row(bias_mu, Outp)
    bsig = _pad_row(bias_sigma, Outp)
    beps = _pad_row(bias_epsilon, Outp)

    bytesz = jnp.dtype(x.dtype).itemsize
    cost = pl.CostEstimate(
        flops=2 * Bp * Inp * Outp,
        transcendentals=0,
        bytes_accessed=bytesz * (Bp * Inp + 2 * Inp * Outp + Inp
                                 + 4 * Outp + Bp * Outp))

    out = pl.pallas_call(
        _noisy_linear_kernel,
        out_shape=jax.ShapeDtypeStruct((Bp, Outp), x.dtype),
        grid_spec=pltpu.PrefetchScalarGridSpec(
            num_scalar_prefetch=0,
            grid=grid,
            in_specs=[
                pl.BlockSpec((tm, tk), lambda i, j, k: (i, k)),   # x
                pl.BlockSpec((tk, tn), lambda i, j, k: (k, j)),   # w_mu^T
                pl.BlockSpec((tk, tn), lambda i, j, k: (k, j)),   # w_sigma^T
                pl.BlockSpec((tk, 1), lambda i, j, k: (k, 0)),    # eps_in
                pl.BlockSpec((1, tn), lambda i, j, k: (0, j)),    # eps_out
                pl.BlockSpec((1, tn), lambda i, j, k: (0, j)),    # b_mu
                pl.BlockSpec((1, tn), lambda i, j, k: (0, j)),    # b_sigma
                pl.BlockSpec((1, tn), lambda i, j, k: (0, j)),    # b_eps
            ],
            out_specs=pl.BlockSpec((tm, tn), lambda i, j, k: (i, j)),
            scratch_shapes=[pltpu.VMEM((tm, tn), jnp.float32)]),
        compiler_params=pltpu.CompilerParams(
            dimension_semantics=("parallel", "parallel", "arbitrary"),
            vmem_limit_bytes=_VMEM_LIMIT),
        cost_estimate=cost,
    )(xp, wmu_t, wsig_t, eps_in_p, eps_out_p, bmu, bsig, beps)

    return out[:B, :Out]


def noisy_linear_eval(x, weight_mu, bias_mu):
    """Eval-mode forward: plain F.linear(x, weight_mu, bias_mu)."""
    B, In = x.shape
    Out = weight_mu.shape[0]
    tm, tn, tk, Bp, Inp, Outp, grid = _grid_params(B, In, Out)

    xp = _pad2(x, Bp, Inp)
    wmu_t = _pad2(weight_mu.T, Inp, Outp)
    bmu = _pad_row(bias_mu, Outp)

    bytesz = jnp.dtype(x.dtype).itemsize
    cost = pl.CostEstimate(
        flops=2 * Bp * Inp * Outp,
        transcendentals=0,
        bytes_accessed=bytesz * (Bp * Inp + Inp * Outp + Outp + Bp * Outp))

    out = pl.pallas_call(
        _plain_linear_kernel,
        out_shape=jax.ShapeDtypeStruct((Bp, Outp), x.dtype),
        grid_spec=pltpu.PrefetchScalarGridSpec(
            num_scalar_prefetch=0,
            grid=grid,
            in_specs=[
                pl.BlockSpec((tm, tk), lambda i, j, k: (i, k)),   # x
                pl.BlockSpec((tk, tn), lambda i, j, k: (k, j)),   # w_mu^T
                pl.BlockSpec((1, tn), lambda i, j, k: (0, j)),    # b_mu
            ],
            out_specs=pl.BlockSpec((tm, tn), lambda i, j, k: (i, j)),
            scratch_shapes=[pltpu.VMEM((tm, tn), jnp.float32)]),
        compiler_params=pltpu.CompilerParams(
            dimension_semantics=("parallel", "parallel", "arbitrary"),
            vmem_limit_bytes=_VMEM_LIMIT),
        cost_estimate=cost,
    )(xp, wmu_t, bmu)

    return out[:B, :Out]


def noisy_linear_forward(x, params, training=True):
    if training:
        return noisy_linear_train(
            x, params["weight_mu"], params["weight_sigma"],
            params["eps_in"], params["eps_out_w"],
            params["bias_mu"], params["bias_sigma"], params["bias_epsilon"])
    return noisy_linear_eval(x, params["weight_mu"], params["bias_mu"])


# --------------------------------------------------------------------------
# Deterministic parameter / noise construction (mirrors reset_parameters /
# reset_noise). weight_epsilon is kept in its factorized form for the kernel
# (the module always builds it as an outer product), plus the dense matrix
# for the reference check.
# --------------------------------------------------------------------------
def transform_noise(v):
    return jnp.sign(v) * jnp.sqrt(jnp.abs(v))


def make_noisy_linear_params(key, in_features, out_features, std_init=0.4):
    k1, k2, k3, k4, k5 = jax.random.split(key, 5)
    mu_range = 1.0 / math.sqrt(in_features)

    weight_mu = jax.random.uniform(
        k1, (out_features, in_features), jnp.float32, -mu_range, mu_range)
    weight_sigma = jnp.full((out_features, in_features),
                            std_init / math.sqrt(in_features), jnp.float32)
    bias_mu = jax.random.uniform(
        k2, (out_features,), jnp.float32, -mu_range, mu_range)
    bias_sigma = jnp.full((out_features,),
                          std_init / math.sqrt(out_features), jnp.float32)

    # reset_noise()
    noise_in = NOISY_LAYER_STD * jax.random.normal(k3, (in_features,), jnp.float32)
    noise_out_weight = NOISY_LAYER_STD * jax.random.normal(k4, (out_features,), jnp.float32)
    noise_out_bias = NOISY_LAYER_STD * jax.random.normal(k5, (out_features,), jnp.float32)

    eps_in = transform_noise(noise_in)             # [In]
    eps_out_w = transform_noise(noise_out_weight)  # [Out]
    weight_epsilon = jnp.outer(eps_out_w, eps_in)  # dense, for reference only
    bias_epsilon = transform_noise(noise_out_bias)

    return dict(weight_mu=weight_mu, weight_sigma=weight_sigma,
                eps_in=eps_in, eps_out_w=eps_out_w,
                weight_epsilon=weight_epsilon,
                bias_mu=bias_mu, bias_sigma=bias_sigma,
                bias_epsilon=bias_epsilon)


if __name__ == "__main__":
    key = jax.random.PRNGKey(0)
    k_param, k_x = jax.random.split(key)

    batch, in_features, out_features = 8, 32, 16
    params = make_noisy_linear_params(k_param, in_features, out_features)
    x = jax.random.normal(k_x, (batch, in_features), jnp.float32)

    # Training-mode forward (noisy weights) via the Pallas kernel.
    y = noisy_linear_forward(x, params, training=True)
    y = jax.block_until_ready(y)

    # Pure-JAX reference check.
    w_eff = params["weight_mu"] + params["weight_sigma"] * params["weight_epsilon"]
    b_eff = params["bias_mu"] + params["bias_sigma"] * params["bias_epsilon"]
    y_ref = x @ w_eff.T + b_eff
    assert jnp.allclose(y, y_ref, atol=1e-5, rtol=1e-5), "train mismatch vs reference"

    # Eval-mode forward (mean weights only, separate lean kernel).
    y_eval = noisy_linear_forward(x, params, training=False)
    y_eval = jax.block_until_ready(y_eval)
    y_eval_ref = x @ params["weight_mu"].T + params["bias_mu"]
    assert jnp.allclose(y_eval, y_eval_ref, atol=1e-5, rtol=1e-5), "eval mismatch"

    print("KERNEL_OK")
</pallas_src>

<mosaic_0001>
module attributes {stable_mosaic.version = 11 : i64} {
  func.func @_noisy_linear_kernel(%arg0: i32, %arg1: i32, %arg2: i32, %arg3: memref<8x128xf32, #tpu.memory_space<vmem>>, %arg4: memref<128x128xf32, #tpu.memory_space<vmem>>, %arg5: memref<128x128xf32, #tpu.memory_space<vmem>>, %arg6: memref<128x1xf32, #tpu.memory_space<vmem>>, %arg7: memref<1x128xf32, #tpu.memory_space<vmem>>, %arg8: memref<1x128xf32, #tpu.memory_space<vmem>>, %arg9: memref<1x128xf32, #tpu.memory_space<vmem>>, %arg10: memref<1x128xf32, #tpu.memory_space<vmem>>, %arg11: memref<8x128xf32, #tpu.memory_space<vmem>>, %arg12: memref<8x128xf32, #tpu.memory_space<vmem>>) attributes {dimension_semantics = [#tpu.dimension_semantics<parallel>, #tpu.dimension_semantics<parallel>, #tpu.dimension_semantics<arbitrary>], iteration_bounds = array<i64: 1, 1, 1>, scalar_prefetch = 0 : i64, scratch_operands = 1 : i64, tpu.core_type = #tpu.core_type<tc>, window_params = [{transform_indices = @transform_0, window_bounds = array<i64: 8, 128>}, {transform_indices = @transform_1, window_bounds = array<i64: 128, 128>}, {transform_indices = @transform_2, window_bounds = array<i64: 128, 128>}, {transform_indices = @transform_3, window_bounds = array<i64: 128, 1>}, {transform_indices = @transform_4, window_bounds = array<i64: 1, 128>}, {transform_indices = @transform_5, window_bounds = array<i64: 1, 128>}, {transform_indices = @transform_6, window_bounds = array<i64: 1, 128>}, {transform_indices = @transform_7, window_bounds = array<i64: 1, 128>}, {transform_indices = @transform_8, window_bounds = array<i64: 8, 128>}]} {
    %c0_i32 = arith.constant 0 : i32
    %0 = arith.cmpi eq, %arg2, %c0_i32 : i32
    %1 = arith.extui %0 : i1 to i32
    %c0_i32_0 = arith.constant 0 : i32
    %2 = arith.cmpi ne, %1, %c0_i32_0 : i32
    scf.if %2 {
      %cst_16 = arith.constant 0.000000e+00 : f32
      %20 = vector.broadcast %cst_16 : f32 to vector<8x128xf32>
      %c0_17 = arith.constant 0 : index
      %c0_18 = arith.constant 0 : index
      %21 = vector.load %arg12[%c0_17, %c0_18] : memref<8x128xf32, #tpu.memory_space<vmem>>, vector<8x128xf32>
      tpu.vector_store %arg12[%c0_17, %c0_18], %20 {strides = array<i32>} : memref<8x128xf32, #tpu.memory_space<vmem>>, vector<8x128xf32>,
    } else {
    }
    %c0 = arith.constant 0 : index
    %c0_1 = arith.constant 0 : index
    %3 = vector.load %arg6[%c0, %c0_1] : memref<128x1xf32, #tpu.memory_space<vmem>>, vector<128x1xf32>
    %c0_2 = arith.constant 0 : index
    %c0_3 = arith.constant 0 : index
    %4 = vector.load %arg7[%c0_2, %c0_3] : memref<1x128xf32, #tpu.memory_space<vmem>>, vector<1x128xf32>
    %5 = vector.broadcast %3 : vector<128x1xf32> to vector<128x128xf32>
    %6 = vector.broadcast %4 : vector<1x128xf32> to vector<128x128xf32>
    %7 = arith.mulf %5, %6 : vector<128x128xf32>
    %c0_4 = arith.constant 0 : index
    %c0_5 = arith.constant 0 : index
    %8 = vector.load %arg4[%c0_4, %c0_5] : memref<128x128xf32, #tpu.memory_space<vmem>>, vector<128x128xf32>
    %c0_6 = arith.constant 0 : index
    %c0_7 = arith.constant 0 : index
    %9 = vector.load %arg5[%c0_6, %c0_7] : memref<128x128xf32, #tpu.memory_space<vmem>>, vector<128x128xf32>
    %10 = arith.mulf %9, %7 : vector<128x128xf32>
    %11 = arith.addf %8, %10 : vector<128x128xf32>
    %c0_8 = arith.constant 0 : index
    %c0_9 = arith.constant 0 : index
    %12 = vector.load %arg12[%c0_8, %c0_9] : memref<8x128xf32, #tpu.memory_space<vmem>>, vector<8x128xf32>
    %c0_10 = arith.constant 0 : index
    %c0_11 = arith.constant 0 : index
    %13 = vector.load %arg3[%c0_10, %c0_11] : memref<8x128xf32, #tpu.memory_space<vmem>>, vector<8x128xf32>
    %cst = arith.constant dense<0.000000e+00> : vector<8x128xf32>
    %14 = tpu.matmul %13, %11, %cst {dimension_numbers = #tpu.dot_dimension_numbers<[1], [0], [0], [1], [0, 0, 1, 1], [], []>} : vector<8x128xf32>, vector<128x128xf32>, vector<8x128xf32> -> vector<8x128xf32>
    %15 = arith.addf %12, %14 : vector<8x128xf32>
    %c0_12 = arith.constant 0 : index
    %c0_13 = arith.constant 0 : index
    %16 = vector.load %arg12[%c0_12, %c0_13] : memref<8x128xf32, #tpu.memory_space<vmem>>, vector<8x128xf32>
    tpu.vector_store %arg12[%c0_12, %c0_13], %15 {strides = array<i32>} : memref<8x128xf32, #tpu.memory_space<vmem>>, vector<8x128xf32>,
    %c0_i32_14 = arith.constant 0 : i32
    %17 = arith.cmpi eq, %arg2, %c0_i32_14 : i32
    %18 = arith.extui %17 : i1 to i32
    %c0_i32_15 = arith.constant 0 : i32
    %19 = arith.cmpi ne, %18, %c0_i32_15 : i32
    scf.if %19 {
      %c0_16 = arith.constant 0 : index
      %c0_17 = arith.constant 0 : index
      %20 = vector.load %arg8[%c0_16, %c0_17] : memref<1x128xf32, #tpu.memory_space<vmem>>, vector<1x128xf32>
      %c0_18 = arith.constant 0 : index
      %c0_19 = arith.constant 0 : index
      %21 = vector.load %arg9[%c0_18, %c0_19] : memref<1x128xf32, #tpu.memory_space<vmem>>, vector<1x128xf32>
      %c0_20 = arith.constant 0 : index
      %c0_21 = arith.constant 0 : index
      %22 = vector.load %arg10[%c0_20, %c0_21] : memref<1x128xf32, #tpu.memory_space<vmem>>, vector<1x128xf32>
      %23 = arith.mulf %21, %22 : vector<1x128xf32>
      %24 = arith.addf %20, %23 : vector<1x128xf32>
      %c0_22 = arith.constant 0 : index
      %c0_23 = arith.constant 0 : index
      %25 = vector.load %arg12[%c0_22, %c0_23] : memref<8x128xf32, #tpu.memory_space<vmem>>, vector<8x128xf32>
      %26 = vector.broadcast %24 : vector<1x128xf32> to vector<8x128xf32>
      %27 = arith.addf %25, %26 : vector<8x128xf32>
      %c0_24 = arith.constant 0 : index
      %c0_25 = arith.constant 0 : index
      %28 = vector.load %arg11[%c0_24, %c0_25] : memref<8x128xf32, #tpu.memory_space<vmem>>, vector<8x128xf32>
      tpu.vector_store %arg11[%c0_24, %c0_25], %27 {strides = array<i32>} : memref<8x128xf32, #tpu.memory_space<vmem>>, vector<8x128xf32>,
    } else {
    }
    return
  }
  func.func @transform_0(%arg0: i32, %arg1: i32, %arg2: i32) -> (i32, i32) {
    %c0_i32 = arith.constant 0 : i32
    return %arg0, %arg2 : i32, i32
  }
  func.func @transform_1(%arg0: i32, %arg1: i32, %arg2: i32) -> (i32, i32) {
    %c0_i32 = arith.constant 0 : i32
    return %arg2, %arg1 : i32, i32
  }
  func.func @transform_2(%arg0: i32, %arg1: i32, %arg2: i32) -> (i32, i32) {
    %c0_i32 = arith.constant 0 : i32
    return %arg2, %arg1 : i32, i32
  }
  func.func @transform_3(%arg0: i32, %arg1: i32, %arg2: i32) -> (i32, i32) {
    %c0_i32 = arith.constant 0 : i32
    %c0_i32_0 = arith.constant 0 : i32
    return %arg2, %c0_i32 : i32, i32
  }
  func.func @transform_4(%arg0: i32, %arg1: i32, %arg2: i32) -> (i32, i32) {
    %c0_i32 = arith.constant 0 : i32
    %c0_i32_0 = arith.constant 0 : i32
    return %c0_i32, %arg1 : i32, i32
  }
  func.func @transform_5(%arg0: i32, %arg1: i32, %arg2: i32) -> (i32, i32) {
    %c0_i32 = arith.constant 0 : i32
    %c0_i32_0 = arith.constant 0 : i32
    return %c0_i32, %arg1 : i32, i32
  }
  func.func @transform_6(%arg0: i32, %arg1: i32, %arg2: i32) -> (i32, i32) {
    %c0_i32 = arith.constant 0 : i32
    %c0_i32_0 = arith.constant 0 : i32
    return %c0_i32, %arg1 : i32, i32
  }
  func.func @transform_7(%arg0: i32, %arg1: i32, %arg2: i32) -> (i32, i32) {
    %c0_i32 = arith.constant 0 : i32
    %c0_i32_0 = arith.constant 0 : i32
    return %c0_i32, %arg1 : i32, i32
  }
  func.func @transform_8(%arg0: i32, %arg1: i32, %arg2: i32) -> (i32, i32) {
    %c0_i32 = arith.constant 0 : i32
    return %arg0, %arg1 : i32, i32
  }
}

</mosaic_0001>

<bundles_post_ra>
// kernel: tpu_custom_call.1
= control target key start
LH: loop header
LB: loop body
LE: loop exit
PB: predicated region body
PF: predicated region fallthrough
CT: control target
= control target key end

     0   :  { %13 = vsyncpa [#allocation4], 0  ;;  %s685_s0 = inlined_call_operand.hbm [shape: f32[8,128], index: 0, kind: input, shape index: {}]   ;;  %s686_s1 = inlined_call_operand.vmem [shape: f32[128,128], index: 1, kind: input, shape index: {}]   ;;  %s687_s2 = inlined_call_operand.hbm [shape: f32[128,128], index: 2, kind: input, shape index: {}]   ;;  %s688_s3 = inlined_call_operand.vmem [shape: f32[128,1], index: 3, kind: input, shape index: {}]   ;;  %s689_s4 = inlined_call_operand.vmem [shape: f32[1,128], index: 4, kind: input, shape index: {}]   ;;  %s690_s5 = inlined_call_operand.vmem [shape: f32[1,128], index: 5, kind: input, shape index: {}]   ;;  %s691_s6 = inlined_call_operand.vmem [shape: f32[1,128], index: 6, kind: input, shape index: {}]   ;;  %s692_s7 = inlined_call_operand.vmem [shape: f32[1,128], index: 7, kind: input, shape index: {}]   ;;  %s693_s8 = inlined_call_operand.hbm [shape: f32[8,128], index: 8, kind: output, shape index: {}]  }
   0x1   :  { %14 = vsyncpa [#allocation7], 0 }
   0x2   :  { %15 = vsyncpa [#allocation5], 0  ;;  %s480_s27 = smov [#allocation3]   ;;  %s481_s29 = smov [#allocation6]  }
   0x3   :  { %s22_s28 = sshll.u32 %s480_s27, 4  ;;  %s33_s30 = sshll.u32 %s481_s29, 4  ;;  %s23_s28 = int_to_ptr.vmem [resolvable:$true] %s22_s28  ;;  %s34_s30 = int_to_ptr.vmem [resolvable:$true] %s33_s30 }
   0x4   :  { %s422_s9 = scalar_lea.vmem %s23_s28, 128  ;;  %p427_p1 = scmp.lt.s32.totalorder %s23_s28, %s23_s28 }
   0x5   :  { %p423_p0 = scmp.ne.s32.totalorder %s23_s28, %s422_s9  ;;  %p428_p2 = scmp.lt.s32.totalorder %s422_s9, %s422_s9 }
   0x7   :  { %p429_p3 = por %p428_p2, %p427_p1 }
   0x9   :  { %p430_p4 = pnand %p429_p3, %p423_p0 }
   0xb   :  { %433 = shalt.err (!%p430_p4)
}
   0xc   :  { %25 = dma.hbm_to_vmem [thread:$0]  %s685_s0, 128, %s23_s28, [#allocation4]  }
   0xd   :  { %s442_s12 = scalar_lea.vmem %s34_s30, 2048  ;;  %p447_p6 = scmp.lt.s32.totalorder %s34_s30, %s34_s30 }
   0xe   :  { %p443_p5 = scmp.ne.s32.totalorder %s34_s30, %s442_s12  ;;  %p448_p7 = scmp.lt.s32.totalorder %s442_s12, %s442_s12 }
  0x10   :  { %p449_p8 = por %p448_p7, %p447_p6 }
  0x12   :  { %p450_p9 = pnand %p449_p8, %p443_p5 }
  0x14   :  { %453 = shalt.err (!%p450_p9)
}
  0x15   :  { %s482_s13 = smov 128   ;;  %s483_s14 = smov 8  }
  0x16   :  { %39 = dma.hbm_to_vmem [thread:$0]  %s687_s2, 2048, %s34_s30, [#allocation7], %s482_s13, %s482_s13, %s483_s14  }
  0x17   :  { %474 = dma.done.wait [#allocation4], 128  }
  0x18   :  { %475 = vsyncadd [#allocation4], 4294967168 }
  0x19   :  { %476 = dma.done.wait [#allocation7], 2048  }
  0x1a   :  { %477 = vsyncadd [#allocation7], 4294965248  ;;  %v484_v0 = vmov 0   ;;  %v76_v1 = vld [vmem:[%s688_s3 + $0x78] sm:$0xff]  ;;  %v74_v2 = vld [vmem:[%s688_s3 + $0x68] sm:$0xff]  ;;  %v485_v5 = vmov 0.0  }
  0x1b   :  { %413 = vset.pattern.permute.xlu1 %v484_v0  ;;  %412 = vset.pattern.permute.xlu0 %v484_v0  ;;  %v75_v3 = vld [vmem:[%s688_s3 + $0x70] sm:$0xff]  ;;  %v73_v4 = vld [vmem:[%s688_s3 + $0x60] sm:$0xff]  ;;  %v72_v6 = vld [vmem:[%s688_s3 + $0x58] sm:$0xff]  ;;  %vm486_vm0 = vmmov 0   ;;  %s487_s12 = smov [#allocation8]  }
  0x1c   :  { %155 = vperm.xlu0 %412, %v76_v1   ;;  %145 = vperm.xlu1 %413, %v74_v2   ;;  %v71_v7 = vld [vmem:[%s688_s3 + $0x50] sm:$0xff]  ;;  %v70_v8 = vld [vmem:[%s688_s3 + $0x48] sm:$0xff]  ;;  %v69_v9 = vld [vmem:[%s688_s3 + $0x40] sm:$0xff]  ;;  %s341_s13 = sshll.u32 %s487_s12, 4  ;;  %s342_s13 = int_to_ptr.vmem [resolvable:$true] %s341_s13 }
  0x1d   :  { %369 = vmatprep.subr.mxu0 %v485_v5  ;;  %v68_v10 = vld [vmem:[%s688_s3 + $0x38] sm:$0xff]  ;;  %v67_v11 = vld [vmem:[%s688_s3 + $0x30] sm:$0xff]  ;;  %v66_v12 = vld [vmem:[%s688_s3 + $0x28] sm:$0xff]  ;;  %401 = vmatprep.mubr.msk.f32.mxu0 %vm486_vm0, %v485_v5  ;;  %p459_p11 = scmp.lt.s32.totalorder %s342_s13, %s342_s13 }
  0x1e   :  { %v65_v13 = vld [vmem:[%s688_s3 + $0x20] sm:$0xff]  ;;  %v64_v14 = vld [vmem:[%s688_s3 + $0x18] sm:$0xff]  ;;  %v63_v15 = vld [vmem:[%s688_s3 + $0x10] sm:$0xff] }
  0x1f   :  { %v62_v16 = vld [vmem:[%s688_s3 + $0x8] sm:$0xff]  ;;  %v61_v17 = vld [vmem:[%s688_s3] sm:$0xff]  ;;  %v195_v23 = vld [vmem:[%s686_s1 + $0x78] sm:$0xff] }
  0x20   :  { %150 = vperm.xlu0 %412, %v75_v3   ;;  %140 = vperm.xlu1 %413, %v73_v4   ;;  %v592_v18 = vld [vmem:[%s689_s4] ss:$0 sm:$0xff]  ;;  %v209_v26 = vld [vmem:[#allocation6 + $0x68] sm:$0xff]  ;;  %v210_v27 = vld [vmem:[#allocation6 + $0x70] sm:$0xff] }
  0x21   :  { %v211_v19 = vld [vmem:[#allocation6 + $0x78] sm:$0xff]  ;;  %v208_v33 = vld [vmem:[#allocation6 + $0x60] sm:$0xff]  ;;  %v194_v34 = vld [vmem:[%s686_s1 + $0x70] sm:$0xff] }
  0x22   :  { %v207_v37 = vld [vmem:[#allocation6 + $0x58] sm:$0xff]  ;;  %v193_v40 = vld [vmem:[%s686_s1 + $0x68] sm:$0xff]  ;;  %v206_v45 = vld [vmem:[#allocation6 + $0x50] sm:$0xff] }
  0x23   :  { %v192_v46 = vld [vmem:[%s686_s1 + $0x60] sm:$0xff]  ;;  %v205_v49 = vld [vmem:[#allocation6 + $0x48] sm:$0xff]  ;;  %v191_v52 = vld [vmem:[%s686_s1 + $0x58] sm:$0xff] }
  0x24   :  { %135 = vperm.xlu0 %412, %v72_v6   ;;  %130 = vperm.xlu1 %413, %v71_v7   ;;  %v204_v57 = vld [vmem:[#allocation6 + $0x40] sm:$0xff]  ;;  %v190_v58 = vld [vmem:[%s686_s1 + $0x50] sm:$0xff]  ;;  %v203_v61 = vld [vmem:[#allocation6 + $0x38] sm:$0xff] }
  0x25   :  { %v189_v0 = vld [vmem:[%s686_s1 + $0x48] sm:$0xff]  ;;  %v202_v6 = vld [vmem:[#allocation6 + $0x30] sm:$0xff]  ;;  %v188_v7 = vld [vmem:[%s686_s1 + $0x40] sm:$0xff] }
  0x28   :  { %125 = vperm.xlu0 %412, %v70_v8   ;;  %120 = vperm.xlu1 %413, %v69_v9  }
  0x2c   :  { %115 = vperm.xlu0 %412, %v68_v10   ;;  %110 = vperm.xlu1 %413, %v67_v11   ;;  %v201_v10 = vld [vmem:[#allocation6 + $0x28] sm:$0xff] }
  0x30   :  { %105 = vperm.xlu0 %412, %v66_v12   ;;  %100 = vperm.xlu1 %413, %v65_v13   ;;  %v187_v13 = vld [vmem:[%s686_s1 + $0x38] sm:$0xff] }
  0x34   :  { %95 = vperm.xlu0 %412, %v64_v14   ;;  %90 = vperm.xlu1 %413, %v63_v15  }
  0x38   :  { %85 = vperm.xlu0 %412, %v62_v16   ;;  %80 = vperm.xlu1 %413, %v61_v17  }
  0x97   :  { %v156_v20 = vpop.permute.xlu0 %155  ;;  %v146_v21 = vpop.permute.xlu1 %145 }
  0x98   :  { %v179_v22 = vmul.f32 %v592_v18, %v156_v20  ;;  %v177_v25 = vmul.f32 %v592_v18, %v146_v21  ;;  %v186_v20 = vld [vmem:[%s686_s1 + $0x30] sm:$0xff] }
  0x9a   :  { %v227_v24 = vmul.f32 %v211_v19, %v179_v22  ;;  %v225_v35 = vmul.f32 %v209_v26, %v177_v25  ;;  %v200_v19 = vld [vmem:[#allocation6 + $0x20] sm:$0xff] }
  0x9b   :  { %v151_v28 = vpop.permute.xlu0 %150  ;;  %v141_v29 = vpop.permute.xlu1 %140  ;;  %v185_v26 = vld [vmem:[%s686_s1 + $0x28] sm:$0xff] }
  0x9c   :  { %v178_v30 = vmul.f32 %v592_v18, %v151_v28  ;;  %v176_v31 = vmul.f32 %v592_v18, %v141_v29  ;;  %v243_v32 = vadd.f32 %v227_v24, %v195_v23  ;;  %v241_v48 = vadd.f32 %v225_v35, %v193_v40  ;;  %v199_v23 = vld [vmem:[#allocation6 + $0x18] sm:$0xff]  ;;  %v197_v35 = vld [vmem:[#allocation6 + $0x8] sm:$0xff] }
  0x9e   :  { %v226_v36 = vmul.f32 %v210_v27, %v178_v30  ;;  %370 = vmatpush3.msra.mxu0 %v243_v32  ;;  %v224_v41 = vmul.f32 %v208_v33, %v176_v31  ;;  %v198_v31 = vld [vmem:[#allocation6 + $0x10] sm:$0xff]  ;;  %v184_v32 = vld [vmem:[%s686_s1 + $0x20] sm:$0xff] }
  0x9f   :  { %v136_v38 = vpop.permute.xlu0 %135  ;;  %v131_v39 = vpop.permute.xlu1 %130  ;;  %371 = vmatprep.subr.mxu0 %v485_v5 }
  0xa0   :  { %v175_v42 = vmul.f32 %v592_v18, %v136_v38  ;;  %v174_v43 = vmul.f32 %v592_v18, %v131_v39  ;;  %v242_v44 = vadd.f32 %v226_v36, %v194_v34  ;;  %v240_v56 = vadd.f32 %v224_v41, %v192_v46  ;;  %v183_v38 = vld [vmem:[%s686_s1 + $0x18] sm:$0xff] }
  0xa2   :  { %v223_v47 = vmul.f32 %v207_v37, %v175_v42  ;;  %372 = vmatpush3.msra.mxu0 %v242_v44  ;;  %v222_v53 = vmul.f32 %v206_v45, %v174_v43  ;;  %v196_v43 = vld [vmem:[#allocation6] sm:$0xff]  ;;  %v182_v44 = vld [vmem:[%s686_s1 + $0x10] sm:$0xff] }
  0xa3   :  { %373 = vmatprep.subr.mxu0 %v485_v5  ;;  %v126_v50 = vpop.permute.xlu0 %125  ;;  %v121_v51 = vpop.permute.xlu1 %120 }
  0xa4   :  { %v173_v54 = vmul.f32 %v592_v18, %v126_v50  ;;  %v172_v55 = vmul.f32 %v592_v18, %v121_v51  ;;  %374 = vmatpush3.msra.mxu0 %v241_v48  ;;  %v239_v60 = vadd.f32 %v223_v47, %v191_v52  ;;  %v238_v4 = vadd.f32 %v222_v53, %v190_v58  ;;  %v181_v47 = vld [vmem:[%s686_s1 + $0x8] sm:$0xff]  ;;  %v245_v52 = vld [vmem:[#allocation3] sm:$0xff] }
  0xa5   :  { %375 = vmatprep.subr.mxu0 %v485_v5  ;;  %v328_v53 = vlaneseq  ;;  %v321_v58 = vld [vmem:[%s690_s5] sm:$0x1] }
  0xa6   :  { %v221_v59 = vmul.f32 %v205_v49, %v173_v54  ;;  %376 = vmatpush3.msra.mxu0 %v240_v56  ;;  %v220_v1 = vmul.f32 %v204_v57, %v172_v55  ;;  %v180_v49 = vld [vmem:[%s686_s1] sm:$0xff] }
  0xa7   :  { %377 = vmatprep.subr.mxu0 %v485_v5  ;;  %v116_v62 = vpop.permute.xlu0 %115  ;;  %v111_v63 = vpop.permute.xlu1 %110  ;;  %v322_v54 = vld [vmem:[%s691_s6] sm:$0x1]  ;;  %v329_v57 = vshrl.u32 %v328_v53, 7  ;;  %s454_s6 = scalar_lea.vmem %s342_s13, 128 }
  0xa8   :  { %v171_v2 = vmul.f32 %v592_v18, %v116_v62  ;;  %v170_v3 = vmul.f32 %v592_v18, %v111_v63  ;;  %378 = vmatpush3.msra.mxu0 %v239_v60  ;;  %v237_v9 = vadd.f32 %v221_v59, %v189_v0  ;;  %v236_v17 = vadd.f32 %v220_v1, %v188_v7  ;;  %v323_v55 = vld [vmem:[%s692_s7] sm:$0x1]  ;;  %p455_p10 = scmp.ne.s32.totalorder %s342_s13, %s454_s6  ;;  %p460_p12 = scmp.lt.s32.totalorder %s454_s6, %s454_s6 }
  0xa9   :  { %379 = vmatprep.subr.mxu0 %v485_v5  ;;  %v324_v56 = vmul.f32 %v323_v55, %v322_v54  ;;  %v330_v60 = vsub.s32 0, %v329_v57 }
  0xaa   :  { %v219_v8 = vmul.f32 %v203_v61, %v171_v2  ;;  %380 = vmatpush3.msra.mxu0 %v238_v4  ;;  %v218_v14 = vmul.f32 %v202_v6, %v170_v3  ;;  %p461_p13 = por %p460_p12, %p459_p11 }
  0xab   :  { %381 = vmatprep.subr.mxu0 %v485_v5  ;;  %v106_v11 = vpop.permute.xlu0 %105  ;;  %v101_v12 = vpop.permute.xlu1 %100  ;;  %v325_v59 = vadd.f32 %v324_v56, %v321_v58 }
  0xac   :  { %v169_v15 = vmul.f32 %v592_v18, %v106_v11  ;;  %v168_v16 = vmul.f32 %v592_v18, %v101_v12  ;;  %382 = vmatpush3.msra.mxu0 %v237_v9  ;;  %v235_v22 = vadd.f32 %v219_v8, %v187_v13  ;;  %v234_v30 = vadd.f32 %v218_v14, %v186_v20  ;;  %p462_p0 = pnand %p461_p13, %p455_p10 }
  0xad   :  { %383 = vmatprep.subr.mxu0 %v485_v5 }
  0xae   :  { %v217_v21 = vmul.f32 %v201_v10, %v169_v15  ;;  %384 = vmatpush3.msra.mxu0 %v236_v17  ;;  %v216_v27 = vmul.f32 %v200_v19, %v168_v16 }
  0xaf   :  { %385 = vmatprep.subr.mxu0 %v485_v5  ;;  %v96_v24 = vpop.permute.xlu0 %95  ;;  %v91_v25 = vpop.permute.xlu1 %90 }
  0xb0   :  { %v167_v28 = vmul.f32 %v592_v18, %v96_v24  ;;  %v166_v29 = vmul.f32 %v592_v18, %v91_v25  ;;  %386 = vmatpush3.msra.mxu0 %v235_v22  ;;  %v233_v34 = vadd.f32 %v217_v21, %v185_v26  ;;  %v232_v42 = vadd.f32 %v216_v27, %v184_v32 }
  0xb1   :  { %387 = vmatprep.subr.mxu0 %v485_v5 }
  0xb2   :  { %v215_v33 = vmul.f32 %v199_v23, %v167_v28  ;;  %388 = vmatpush3.msra.mxu0 %v234_v30  ;;  %v214_v39 = vmul.f32 %v198_v31, %v166_v29 }
  0xb3   :  { %389 = vmatprep.subr.mxu0 %v485_v5  ;;  %v86_v36 = vpop.permute.xlu0 %85  ;;  %v81_v37 = vpop.permute.xlu1 %80 }
  0xb4   :  { %v165_v40 = vmul.f32 %v592_v18, %v86_v36  ;;  %v164_v41 = vmul.f32 %v592_v18, %v81_v37  ;;  %390 = vmatpush3.msra.mxu0 %v233_v34  ;;  %v231_v46 = vadd.f32 %v215_v33, %v183_v38  ;;  %v230_v18 = vadd.f32 %v214_v39, %v182_v44 }
  0xb5   :  { %391 = vmatprep.subr.mxu0 %v485_v5 }
  0xb6   :  { %v213_v45 = vmul.f32 %v197_v35, %v165_v40  ;;  %392 = vmatpush3.msra.mxu0 %v232_v42  ;;  %v212_v48 = vmul.f32 %v196_v43, %v164_v41 }
  0xb7   :  { %393 = vmatprep.subr.mxu0 %v485_v5 }
  0xb8   :  { %394 = vmatpush3.msra.mxu0 %v231_v46  ;;  %v229_v50 = vadd.f32 %v213_v45, %v181_v47  ;;  %v228_v51 = vadd.f32 %v212_v48, %v180_v49 }
  0xb9   :  { %395 = vmatprep.subr.mxu0 %v485_v5 }
  0xba   :  { %396 = vmatpush3.msra.mxu0 %v230_v18 }
  0xbb   :  { %397 = vmatprep.subr.mxu0 %v485_v5 }
  0xbc   :  { %398 = vmatpush3.msra.mxu0 %v229_v50 }
  0xbd   :  { %399 = vmatprep.subr.mxu0 %v485_v5  ;;  %v331_v5 = vrot.slane %v325_v59, %v330_v60 }
  0xbe   :  { %400 = vmatpush3.msra.mxu0 %v228_v51 }
  0xbf   :  { %402 = vmatmul.mubr.f32.vlgmr.msra.gmra.mxu0 %v245_v52 }
 0x17f   :  { %v312_v61 = vpop.f32.mrf.mxu0 }
 0x180   :  { %v333_v62 = vadd.f32 %v331_v5, %v312_v61 }
 0x181   :  { %v403_v63 = vpop.f32.mrf.mxu0 }
 0x182   :  { %334 = vst [vmem:[#allocation8] sm:$0xff] %v333_v62 }
 0x183   :  { %465 = shalt.err (!%p462_p0)
}
 0x184   :  { %344 = dma.vmem_to_hbm [thread:$0]  %s342_s13, 128, %s693_s8, [#allocation5]  }
 0x185   :  { %478 = dma.done.wait [#allocation5], 128  }
 0x186   :  { %479 = vsyncadd [#allocation5], 4294967168 }
 0x187   :  { %348 = vsyncpa [#allocation4], 1 }
 0x188   :  { %349 = vsyncpa [#allocation7], 1 }
 0x189   :  { %350 = vsyncpa [#allocation5], 1 }

</bundles_post_ra>
